<compile_context>
chip_gen: v6e
topology: v6e:2x2x1
jax: 0.10.0
libtpu: 0.0.40
codegen_flags: <defaults>
</compile_context>

<pallas_src>
import functools
import math

import jax
import jax.numpy as jnp
import numpy as np
from jax import lax
from jax.experimental import pallas as pl
from jax.experimental.pallas import tpu as pltpu


def _rotate_half(t):
    half = t.shape[-1] // 2
    return jnp.concatenate([-t[..., half:], t[..., :half]], axis=-1)


# ----------------------------- Pallas kernel ---------------------------------
def lora_qkv_kernel(x_ref, cos_ref, sin_ref, wq_ref, wkva_ref, wkvb_ref, wo_ref,
                    out_ref, kn_scr, kr_scr, v_scr, *, H, HD, MD, R, S, TQ):
    """Grid = (batch, query-tile).  K/V are computed once per batch element
    (qi == 0) into persistent VMEM scratch; each grid step handles TQ queries."""
    qi = pl.program_id(1)
    cdt = kn_scr.dtype            # bf16 MXU-operand dtype
    HHD = H * HD

    dn = (((1,), (0,)), ((), ()))   # contract a.last with b.first   (A @ B)
    dt_ = (((1,), (1,)), ((), ()))  # contract last dims of both     (A @ B^T, no explicit .T)

    # ---------------- K / V latent path: once per batch element ----------------
    @pl.when(qi == 0)
    def _():
        x = x_ref[0].astype(cdt)                                       # (S, hidden)
        ckv = lax.dot_general(x, wkva_ref[...], dn,
                              preferred_element_type=jnp.float32)      # (S, R+MD)
        kv_lat = ckv[:, :R]
        k_rope = ckv[:, R:]                                            # (S, MD)
        # RoPE on the shared MQA rope key (elementwise kept in f32).
        cos_k = cos_ref[:, :MD]
        sin_k = sin_ref[:, :MD]
        k_rope = k_rope * cos_k + _rotate_half(k_rope) * sin_k
        kr_scr[...] = k_rope.astype(cdt)
        # kv_b projection; wrapper permuted columns to [k_nope_all | v_all].
        kvb = lax.dot_general(kv_lat.astype(cdt), wkvb_ref[...], dn,
                              preferred_element_type=jnp.float32)      # (S, 2*H*HD)
        kn_scr[...] = kvb[:, :HHD].astype(cdt)
        v_scr[...] = kvb[:, HHD:].astype(cdt)

    # ------------------------- Q path for this q-tile --------------------------
    q0 = pl.multiple_of(qi * TQ, TQ)
    xq = x_ref[0, pl.ds(q0, TQ), :].astype(cdt)                        # (TQ, hidden)
    # 1/sqrt(HD+MD) folded into Wq; columns permuted to [nope_all | rope_all].
    q_all = lax.dot_general(xq, wq_ref[...], dn,
                            preferred_element_type=jnp.float32)        # (TQ, H*(HD+MD))
    q_nope = q_all[:, :HHD]                                            # (TQ, H*HD)
    q_rope = q_all[:, HHD:]                                            # (TQ, H*MD)

    # RoPE on all heads' rope slices in one wide VPU pass (cos/sin pre-tiled).
    cos_q = cos_ref[pl.ds(q0, TQ), :]                                  # (TQ, H*MD)
    sin_q = sin_ref[pl.ds(q0, TQ), :]
    half = MD // 2
    rot = jnp.concatenate(
        [p for h in range(H)
         for p in (-q_rope[:, h * MD + half:(h + 1) * MD],
                   q_rope[:, h * MD:h * MD + half])],
        axis=-1)                                                       # per-head rotate_half
    q_rope = q_rope * cos_q + rot * sin_q

    q_nope = q_nope.astype(cdt)
    q_rope = q_rope.astype(cdt)

    # --------------- attention: in-kernel causal mask, split scores ------------
    row = q0 + lax.broadcasted_iota(jnp.int32, (TQ, S), 0)
    col = lax.broadcasted_iota(jnp.int32, (TQ, S), 1)
    causal = row >= col

    k_rope_all = kr_scr[...]                                           # (S, MD)
    out_acc = jnp.zeros((TQ, out_ref.shape[-1]), jnp.float32)
    for h in range(H):                                                 # static unroll (H small)
        s = lax.dot_general(q_nope[:, h * HD:(h + 1) * HD],
                            kn_scr[:, h * HD:(h + 1) * HD], dt_,
                            preferred_element_type=jnp.float32)        # (TQ, S)
        s = s + lax.dot_general(q_rope[:, h * MD:(h + 1) * MD],
                                k_rope_all, dt_,
                                preferred_element_type=jnp.float32)
        s = jnp.where(causal, s, -1e9)
        m = jnp.max(s, axis=-1, keepdims=True)
        e = jnp.exp(s - m)
        p = e * pl.reciprocal(jnp.sum(e, axis=-1, keepdims=True), approx=True)
        p = p.astype(cdt)
        ah = lax.dot_general(p, v_scr[:, h * HD:(h + 1) * HD], dn,
                             preferred_element_type=jnp.float32)       # (TQ, HD)
        # Fold o_proj per head: avoids lane-misaligned concat of head outputs.
        out_acc = out_acc + lax.dot_general(
            ah.astype(cdt), wo_ref[h * HD:(h + 1) * HD, :], dn,
            preferred_element_type=jnp.float32)

    out_ref[0] = out_acc.astype(out_ref.dtype)


# --------------------------------- wrapper ------------------------------------
def lora_qkv_forward(x, cos, sin, wq, wkva, wkvb, wo, *, H, HD, MD, R, q_tile=128):
    """x: (B, S, hidden).  Weights in PyTorch nn.Linear layout (out, in).
    cos/sin: (S, qk_mqa_dim), shared across batch."""
    B, S, Dh = x.shape
    Dout = wo.shape[0]
    TQ = q_tile if (S % q_tile == 0) else S
    n_qt = S // TQ
    cdt = jnp.bfloat16
    scale = 1.0 / math.sqrt(HD + MD)

    # Host-side column permutations so every in-kernel slice is contiguous:
    #   q output:   [nope(h0..hH-1) | rope(h0..hH-1)]
    #   kv_b output:[k_nope(all heads) | v(all heads)]
    perm_q = np.concatenate(
        [np.concatenate([h * (HD + MD) + np.arange(HD) for h in range(H)]),
         np.concatenate([h * (HD + MD) + HD + np.arange(MD) for h in range(H)])])
    perm_kv = np.concatenate(
        [np.concatenate([h * 2 * HD + np.arange(HD) for h in range(H)]),
         np.concatenate([h * 2 * HD + HD + np.arange(HD) for h in range(H)])])

    wq_t = (wq.T * scale)[:, perm_q].astype(cdt)     # (Dh, H*(HD+MD)), scale folded
    wkva_t = wkva.T.astype(cdt)                      # (Dh, R+MD)
    wkvb_t = wkvb.T[:, perm_kv].astype(cdt)          # (R, 2*H*HD)
    wo_t = wo.T.astype(cdt)                          # (H*HD, Dout)

    # cos/sin shared across batch, pre-tiled to H*MD so q-RoPE is one wide op.
    cos_t = jnp.tile(cos.astype(jnp.float32), (1, H))   # (S, H*MD)
    sin_t = jnp.tile(sin.astype(jnp.float32), (1, H))

    kernel = functools.partial(lora_qkv_kernel, H=H, HD=HD, MD=MD, R=R, S=S, TQ=TQ)

    # TODO(synk): on v7x (64 MiB VMEM) consider pipeline_mode=pl.Buffered(1) on
    # the constant-index weight specs to drop their second pipeline buffer.
    return pl.pallas_call(
        kernel,
        out_shape=jax.ShapeDtypeStruct((B, S, Dout), x.dtype),
        grid_spec=pltpu.PrefetchScalarGridSpec(
            num_scalar_prefetch=0,
            grid=(B, n_qt),
            in_specs=[
                pl.BlockSpec((1, S, Dh), lambda b, q: (b, 0, 0)),     # x (full seq per batch)
                pl.BlockSpec((S, H * MD), lambda b, q: (0, 0)),       # cos (shared, DMA'd once)
                pl.BlockSpec((S, H * MD), lambda b, q: (0, 0)),       # sin
                pl.BlockSpec(wq_t.shape, lambda b, q: (0, 0)),        # Wq^T   (scaled, permuted)
                pl.BlockSpec(wkva_t.shape, lambda b, q: (0, 0)),      # Wkv_a^T
                pl.BlockSpec(wkvb_t.shape, lambda b, q: (0, 0)),      # Wkv_b^T (permuted)
                pl.BlockSpec(wo_t.shape, lambda b, q: (0, 0)),        # Wo^T
            ],
            out_specs=pl.BlockSpec((1, TQ, Dout), lambda b, q: (b, q, 0)),
            scratch_shapes=[
                pltpu.VMEM((S, H * HD), cdt),   # k_nope, all heads (persists across q-tiles)
                pltpu.VMEM((S, MD), cdt),       # roped shared (MQA) k_rope
                pltpu.VMEM((S, H * HD), cdt),   # v, all heads
            ],
        ),
        compiler_params=pltpu.CompilerParams(
            dimension_semantics=("parallel", "arbitrary"),
            vmem_limit_bytes=64 * 1024 * 1024,
        ),
    )(x, cos_t, sin_t, wq_t, wkva_t, wkvb_t, wo_t)


# ---------------------------- pure-JAX reference ------------------------------
def reference_forward(x, cos, sin, wq, wkva, wkvb, wo, *, H, HD, MD, R):
    B, S, _ = x.shape

    def rot(t):
        half = t.shape[-1] // 2
        return jnp.concatenate([-t[..., half:], t[..., :half]], axis=-1)

    q = jnp.einsum('bsd,od->bso', x, wq).reshape(B, S, H, HD + MD).transpose(0, 2, 1, 3)
    q_nope, q_rope = q[..., :HD], q[..., HD:]

    ckv = jnp.einsum('bsd,od->bso', x, wkva)
    kv_nope, k_rope = ckv[..., :R], ckv[..., R:]
    k_rope = k_rope[:, None]                                  # (B,1,S,MD)

    cos_u, sin_u = cos[None, None], sin[None, None]           # (1,1,S,MD)
    q_rope = q_rope * cos_u + rot(q_rope) * sin_u
    k_rope = k_rope * cos_u + rot(k_rope) * sin_u
    q_full = jnp.concatenate([q_nope, q_rope], axis=-1)

    kvb = jnp.einsum('bsr,or->bso', kv_nope, wkvb).reshape(B, S, H, 2 * HD).transpose(0, 2, 1, 3)
    k_nope, v_nope = kvb[..., :HD], kvb[..., HD:]
    k_full = jnp.concatenate([k_nope, jnp.broadcast_to(k_rope, (B, H, S, MD))], axis=-1)

    scores = jnp.einsum('bhqd,bhkd->bhqk', q_full, k_full) / math.sqrt(HD + MD)
    causal = jnp.where(jnp.tril(jnp.ones((S, S), bool)), 0.0, -1e9).astype(scores.dtype)
    scores = scores + causal
    probs = jax.nn.softmax(scores.astype(jnp.float32), axis=-1).astype(x.dtype)
    attn = jnp.einsum('bhqk,bhkd->bhqd', probs, v_nope).transpose(0, 2, 1, 3).reshape(B, S, H * HD)
    return jnp.einsum('bsd,od->bso', attn, wo)


# ------------------------------------ main -------------------------------------
if __name__ == "__main__":
    # Small, LoraQKV-consistent config: head_dim == qk_mqa_dim * collapse.
    B, S, HIDDEN = 2, 8, 32
    H = 2            # num_attention_heads
    HD = 64          # head_dim
    MD = 64          # qk_mqa_dim (collapse = 1)
    R = 128          # kv_lora_rank

    key = jax.random.PRNGKey(0)
    k = iter(jax.random.split(key, 8))
    dt = jnp.float32

    x = jax.random.normal(next(k), (B, S, HIDDEN), dt) * 0.5
    wq = jax.random.normal(next(k), (H * (HD + MD), HIDDEN), dt) * 0.05
    wkva = jax.random.normal(next(k), (R + MD, HIDDEN), dt) * 0.05
    wkvb = jax.random.normal(next(k), (2 * H * HD, R), dt) * 0.05
    wo = jax.random.normal(next(k), (HIDDEN, H * HD), dt) * 0.05

    # position embeddings (cos, sin): (S, qk_mqa_dim), shared across batch.
    inv_freq = 1.0 / (10000.0 ** (jnp.arange(0, MD, 2, dtype=dt) / MD))
    pos = jnp.arange(S, dtype=dt)
    ang = pos[:, None] * inv_freq[None, :]                  # (S, MD/2)
    ang = jnp.concatenate([ang, ang], axis=-1)              # (S, MD)
    cos = jnp.cos(ang).astype(dt)
    sin = jnp.sin(ang).astype(dt)

    out = lora_qkv_forward(x, cos, sin, wq, wkva, wkvb, wo, H=H, HD=HD, MD=MD, R=R)
    out = jax.block_until_ready(out)

    ref = jax.block_until_ready(
        reference_forward(x, cos, sin, wq, wkva, wkvb, wo, H=H, HD=HD, MD=MD, R=R))

    np.testing.assert_allclose(np.asarray(out), np.asarray(ref), rtol=2e-2, atol=2e-2)
    print("KERNEL_OK")
</pallas_src>

<mosaic_0001>
module attributes {stable_mosaic.version = 11 : i64} {
  func.func @lora_qkv_kernel(%arg0: i32, %arg1: i32, %arg2: memref<1x8x32xf32, #tpu.memory_space<vmem>>, %arg3: memref<8x128xf32, #tpu.memory_space<vmem>>, %arg4: memref<8x128xf32, #tpu.memory_space<vmem>>, %arg5: memref<32x256xbf16, #tpu.memory_space<vmem>>, %arg6: memref<32x192xbf16, #tpu.memory_space<vmem>>, %arg7: memref<128x256xbf16, #tpu.memory_space<vmem>>, %arg8: memref<128x32xbf16, #tpu.memory_space<vmem>>, %arg9: memref<1x8x32xf32, #tpu.memory_space<vmem>>, %arg10: memref<8x128xbf16, #tpu.memory_space<vmem>>, %arg11: memref<8x64xbf16, #tpu.memory_space<vmem>>, %arg12: memref<8x128xbf16, #tpu.memory_space<vmem>>) attributes {dimension_semantics = [#tpu.dimension_semantics<parallel>, #tpu.dimension_semantics<arbitrary>], iteration_bounds = array<i64: 2, 1>, scalar_prefetch = 0 : i64, scratch_operands = 3 : i64, tpu.core_type = #tpu.core_type<tc>, window_params = [{transform_indices = @transform_0, window_bounds = array<i64: 1, 8, 32>}, {pipeline_mode = #tpu.pipeline_mode<synchronous>, transform_indices = @transform_1, window_bounds = array<i64: 8, 128>}, {pipeline_mode = #tpu.pipeline_mode<synchronous>, transform_indices = @transform_2, window_bounds = array<i64: 8, 128>}, {pipeline_mode = #tpu.pipeline_mode<synchronous>, transform_indices = @transform_3, window_bounds = array<i64: 32, 256>}, {pipeline_mode = #tpu.pipeline_mode<synchronous>, transform_indices = @transform_4, window_bounds = array<i64: 32, 192>}, {pipeline_mode = #tpu.pipeline_mode<synchronous>, transform_indices = @transform_5, window_bounds = array<i64: 128, 256>}, {pipeline_mode = #tpu.pipeline_mode<synchronous>, transform_indices = @transform_6, window_bounds = array<i64: 128, 32>}, {transform_indices = @transform_7, window_bounds = array<i64: 1, 8, 32>}]} {
    %c0_i32 = arith.constant 0 : i32
    %0 = arith.cmpi eq, %arg1, %c0_i32 : i32
    %1 = arith.extui %0 : i1 to i32
    %c0_i32_0 = arith.constant 0 : i32
    %2 = arith.cmpi ne, %1, %c0_i32_0 : i32
    scf.if %2 {
      %c0_39 = arith.constant 0 : index
      %c0_40 = arith.constant 0 : index
      %c0_41 = arith.constant 0 : index
      %91 = vector.load %arg2[%c0_39, %c0_40, %c0_41] : memref<1x8x32xf32, #tpu.memory_space<vmem>>, vector<1x8x32xf32>
      %92 = vector.shape_cast %91 : vector<1x8x32xf32> to vector<8x32xf32>
      %93 = arith.truncf %92 : vector<8x32xf32> to vector<8x32xbf16>
      %c0_42 = arith.constant 0 : index
      %c0_43 = arith.constant 0 : index
      %94 = vector.load %arg6[%c0_42, %c0_43] : memref<32x192xbf16, #tpu.memory_space<vmem>>, vector<32x192xbf16>
      %cst_44 = arith.constant dense<0.000000e+00> : vector<8x192xf32>
      %95 = tpu.matmul %93, %94, %cst_44 {dimension_numbers = #tpu.dot_dimension_numbers<[1], [0], [0], [1], [0, 0, 1, 1], [], []>} : vector<8x32xbf16>, vector<32x192xbf16>, vector<8x192xf32> -> vector<8x192xf32>
      %96 = vector.extract_strided_slice %95 {offsets = [0, 0], sizes = [8, 128], strides = [1, 1]} : vector<8x192xf32> to vector<8x128xf32>
      %97 = vector.extract_strided_slice %95 {offsets = [0, 128], sizes = [8, 64], strides = [1, 1]} : vector<8x192xf32> to vector<8x64xf32>
      %c0_45 = arith.constant 0 : index
      %c0_46 = arith.constant 0 : index
      %98 = vector.load %arg3[%c0_45, %c0_46] : memref<8x128xf32, #tpu.memory_space<vmem>>, vector<8x64xf32>
      %c0_47 = arith.constant 0 : index
      %c0_48 = arith.constant 0 : index
      %99 = vector.load %arg4[%c0_47, %c0_48] : memref<8x128xf32, #tpu.memory_space<vmem>>, vector<8x64xf32>
      %100 = arith.mulf %97, %98 : vector<8x64xf32>
      %101 = vector.extract_strided_slice %97 {offsets = [0, 32], sizes = [8, 32], strides = [1, 1]} : vector<8x64xf32> to vector<8x32xf32>
      %cst_49 = arith.constant 0.000000e+00 : f32
      %102 = vector.broadcast %cst_49 : f32 to vector<8x32xf32>
      %103 = arith.subf %102, %101 : vector<8x32xf32>
      %104 = vector.extract_strided_slice %97 {offsets = [0, 0], sizes = [8, 32], strides = [1, 1]} : vector<8x64xf32> to vector<8x32xf32>
      %105 = tpu.concatenate %103, %104 in 1 : vector<8x32xf32>, vector<8x32xf32> -> vector<8x64xf32>
      %106 = arith.mulf %105, %99 : vector<8x64xf32>
      %107 = arith.addf %100, %106 : vector<8x64xf32>
      %108 = arith.truncf %107 : vector<8x64xf32> to vector<8x64xbf16>
      %c0_50 = arith.constant 0 : index
      %c0_51 = arith.constant 0 : index
      %109 = vector.load %arg11[%c0_50, %c0_51] : memref<8x64xbf16, #tpu.memory_space<vmem>>, vector<8x64xbf16>
      tpu.vector_store %arg11[%c0_50, %c0_51], %108 {strides = array<i32>} : memref<8x64xbf16, #tpu.memory_space<vmem>>, vector<8x64xbf16>,
      %110 = arith.truncf %96 : vector<8x128xf32> to vector<8x128xbf16>
      %c0_52 = arith.constant 0 : index
      %c0_53 = arith.constant 0 : index
      %111 = vector.load %arg7[%c0_52, %c0_53] : memref<128x256xbf16, #tpu.memory_space<vmem>>, vector<128x256xbf16>
      %cst_54 = arith.constant dense<0.000000e+00> : vector<8x256xf32>
      %112 = tpu.matmul %110, %111, %cst_54 {dimension_numbers = #tpu.dot_dimension_numbers<[1], [0], [0], [1], [0, 0, 1, 1], [], []>} : vector<8x128xbf16>, vector<128x256xbf16>, vector<8x256xf32> -> vector<8x256xf32>
      %113 = vector.extract_strided_slice %112 {offsets = [0, 0], sizes = [8, 128], strides = [1, 1]} : vector<8x256xf32> to vector<8x128xf32>
      %114 = arith.truncf %113 : vector<8x128xf32> to vector<8x128xbf16>
      %c0_55 = arith.constant 0 : index
      %c0_56 = arith.constant 0 : index
      %115 = vector.load %arg10[%c0_55, %c0_56] : memref<8x128xbf16, #tpu.memory_space<vmem>>, vector<8x128xbf16>
      tpu.vector_store %arg10[%c0_55, %c0_56], %114 {strides = array<i32>} : memref<8x128xbf16, #tpu.memory_space<vmem>>, vector<8x128xbf16>,
      %116 = vector.extract_strided_slice %112 {offsets = [0, 128], sizes = [8, 128], strides = [1, 1]} : vector<8x256xf32> to vector<8x128xf32>
      %117 = arith.truncf %116 : vector<8x128xf32> to vector<8x128xbf16>
      %c0_57 = arith.constant 0 : index
      %c0_58 = arith.constant 0 : index
      %118 = vector.load %arg12[%c0_57, %c0_58] : memref<8x128xbf16, #tpu.memory_space<vmem>>, vector<8x128xbf16>
      tpu.vector_store %arg12[%c0_57, %c0_58], %117 {strides = array<i32>} : memref<8x128xbf16, #tpu.memory_space<vmem>>, vector<8x128xbf16>,
    } else {
    }
    %c8_i32 = arith.constant 8 : i32
    %3 = arith.muli %arg1, %c8_i32 : i32
    %4 = tpu.assume_multiple %3, 8 : i32
    %c0 = arith.constant 0 : index
    %5 = arith.index_cast %4 : i32 to index
    %c0_1 = arith.constant 0 : index
    %6 = vector.load %arg2[%c0, %5, %c0_1] : memref<1x8x32xf32, #tpu.memory_space<vmem>>, vector<1x8x32xf32>
    %7 = vector.shape_cast %6 : vector<1x8x32xf32> to vector<8x32xf32>
    %8 = arith.truncf %7 : vector<8x32xf32> to vector<8x32xbf16>
    %c0_2 = arith.constant 0 : index
    %c0_3 = arith.constant 0 : index
    %9 = vector.load %arg5[%c0_2, %c0_3] : memref<32x256xbf16, #tpu.memory_space<vmem>>, vector<32x256xbf16>
    %cst = arith.constant dense<0.000000e+00> : vector<8x256xf32>
    %10 = tpu.matmul %8, %9, %cst {dimension_numbers = #tpu.dot_dimension_numbers<[1], [0], [0], [1], [0, 0, 1, 1], [], []>} : vector<8x32xbf16>, vector<32x256xbf16>, vector<8x256xf32> -> vector<8x256xf32>
    %11 = vector.extract_strided_slice %10 {offsets = [0, 0], sizes = [8, 128], strides = [1, 1]} : vector<8x256xf32> to vector<8x128xf32>
    %12 = vector.extract_strided_slice %10 {offsets = [0, 128], sizes = [8, 128], strides = [1, 1]} : vector<8x256xf32> to vector<8x128xf32>
    %13 = arith.index_cast %4 : i32 to index
    %c0_4 = arith.constant 0 : index
    %14 = vector.load %arg3[%13, %c0_4] : memref<8x128xf32, #tpu.memory_space<vmem>>, vector<8x128xf32>
    %15 = arith.index_cast %4 : i32 to index
    %c0_5 = arith.constant 0 : index
    %16 = vector.load %arg4[%15, %c0_5] : memref<8x128xf32, #tpu.memory_space<vmem>>, vector<8x128xf32>
    %17 = vector.extract_strided_slice %12 {offsets = [0, 32], sizes = [8, 32], strides = [1, 1]} : vector<8x128xf32> to vector<8x32xf32>
    %cst_6 = arith.constant 0.000000e+00 : f32
    %18 = vector.broadcast %cst_6 : f32 to vector<8x32xf32>
    %19 = arith.subf %18, %17 : vector<8x32xf32>
    %20 = vector.extract_strided_slice %12 {offsets = [0, 0], sizes = [8, 32], strides = [1, 1]} : vector<8x128xf32> to vector<8x32xf32>
    %21 = vector.extract_strided_slice %12 {offsets = [0, 96], sizes = [8, 32], strides = [1, 1]} : vector<8x128xf32> to vector<8x32xf32>
    %cst_7 = arith.constant 0.000000e+00 : f32
    %22 = vector.broadcast %cst_7 : f32 to vector<8x32xf32>
    %23 = arith.subf %22, %21 : vector<8x32xf32>
    %24 = vector.extract_strided_slice %12 {offsets = [0, 64], sizes = [8, 32], strides = [1, 1]} : vector<8x128xf32> to vector<8x32xf32>
    %25 = tpu.concatenate %19, %20, %23, %24 in 1 : vector<8x32xf32>, vector<8x32xf32>, vector<8x32xf32>, vector<8x32xf32> -> vector<8x128xf32>
    %26 = arith.mulf %12, %14 : vector<8x128xf32>
    %27 = arith.mulf %25, %16 : vector<8x128xf32>
    %28 = arith.addf %26, %27 : vector<8x128xf32>
    %29 = arith.truncf %11 : vector<8x128xf32> to vector<8x128xbf16>
    %30 = arith.truncf %28 : vector<8x128xf32> to vector<8x128xbf16>
    %31 = tpu.iota {dimensions = array<i32: 0>} : vector<8x8xi32>
    %32 = vector.broadcast %4 : i32 to vector<8x8xi32>
    %33 = arith.addi %32, %31 : vector<8x8xi32>
    %34 = tpu.iota {dimensions = array<i32: 1>} : vector<8x8xi32>
    %35 = arith.cmpi sge, %33, %34 : vector<8x8xi32>
    %c0_8 = arith.constant 0 : index
    %c0_9 = arith.constant 0 : index
    %36 = vector.load %arg11[%c0_8, %c0_9] : memref<8x64xbf16, #tpu.memory_space<vmem>>, vector<8x64xbf16>
    %cst_10 = arith.constant 0.000000e+00 : f32
    %37 = vector.broadcast %cst_10 : f32 to vector<8x32xf32>
    %38 = vector.extract_strided_slice %29 {offsets = [0, 0], sizes = [8, 64], strides = [1, 1]} : vector<8x128xbf16> to vector<8x64xbf16>
    %c0_11 = arith.constant 0 : index
    %c0_12 = arith.constant 0 : index
    %39 = vector.load %arg10[%c0_11, %c0_12] : memref<8x128xbf16, #tpu.memory_space<vmem>>, vector<8x64xbf16>
    %cst_13 = arith.constant dense<0.000000e+00> : vector<8x8xf32>
    %40 = tpu.matmul %38, %39, %cst_13 {dimension_numbers = #tpu.dot_dimension_numbers<[1], [1], [0], [0], [0, 0, 1, 0], [], []>} : vector<8x64xbf16>, vector<8x64xbf16>, vector<8x8xf32> -> vector<8x8xf32>
    %41 = vector.extract_strided_slice %30 {offsets = [0, 0], sizes = [8, 64], strides = [1, 1]} : vector<8x128xbf16> to vector<8x64xbf16>
    %cst_14 = arith.constant dense<0.000000e+00> : vector<8x8xf32>
    %42 = tpu.matmul %41, %36, %cst_14 {dimension_numbers = #tpu.dot_dimension_numbers<[1], [1], [0], [0], [0, 0, 1, 0], [], []>} : vector<8x64xbf16>, vector<8x64xbf16>, vector<8x8xf32> -> vector<8x8xf32>
    %43 = arith.addf %40, %42 : vector<8x8xf32>
    %cst_15 = arith.constant -1.000000e+09 : f32
    %44 = vector.broadcast %cst_15 : f32 to vector<8x8xf32>
    %45 = arith.select %35, %43, %44 : vector<8x8xi1>, vector<8x8xf32>
    %cst_16 = arith.constant dense<0xFF800000> : vector<8xf32>
    %46 = vector.multi_reduction <maximumf>, %45, %cst_16 [1] : vector<8x8xf32> to vector<8xf32>
    %47 = vector.shape_cast %46 : vector<8xf32> to vector<8x1xf32>
    %48 = vector.broadcast %47 : vector<8x1xf32> to vector<8x8xf32>
    %49 = arith.subf %45, %48 : vector<8x8xf32>
    %50 = math.exp %49 : vector<8x8xf32>
    %cst_17 = arith.constant dense<0.000000e+00> : vector<8xf32>
    %51 = vector.multi_reduction <add>, %50, %cst_17 [1] : vector<8x8xf32> to vector<8xf32>
    %52 = vector.shape_cast %51 : vector<8xf32> to vector<8x1xf32>
    %53 = tpu.reciprocal %52 {approx = true} : vector<8x1xf32> -> vector<8x1xf32>
    %54 = vector.broadcast %53 : vector<8x1xf32> to vector<8x8xf32>
    %55 = arith.mulf %50, %54 : vector<8x8xf32>
    %56 = arith.truncf %55 : vector<8x8xf32> to vector<8x8xbf16>
    %c0_18 = arith.constant 0 : index
    %c0_19 = arith.constant 0 : index
    %57 = vector.load %arg12[%c0_18, %c0_19] : memref<8x128xbf16, #tpu.memory_space<vmem>>, vector<8x64xbf16>
    %cst_20 = arith.constant dense<0.000000e+00> : vector<8x64xf32>
    %58 = tpu.matmul %56, %57, %cst_20 {dimension_numbers = #tpu.dot_dimension_numbers<[1], [0], [0], [1], [0, 0, 1, 1], [], []>} : vector<8x8xbf16>, vector<8x64xbf16>, vector<8x64xf32> -> vector<8x64xf32>
    %59 = arith.truncf %58 : vector<8x64xf32> to vector<8x64xbf16>
    %c0_21 = arith.constant 0 : index
    %c0_22 = arith.constant 0 : index
    %60 = vector.load %arg8[%c0_21, %c0_22] : memref<128x32xbf16, #tpu.memory_space<vmem>>, vector<64x32xbf16>
    %cst_23 = arith.constant dense<0.000000e+00> : vector<8x32xf32>
    %61 = tpu.matmul %59, %60, %cst_23 {dimension_numbers = #tpu.dot_dimension_numbers<[1], [0], [0], [1], [0, 0, 1, 1], [], []>} : vector<8x64xbf16>, vector<64x32xbf16>, vector<8x32xf32> -> vector<8x32xf32>
    %62 = arith.addf %37, %61 : vector<8x32xf32>
    %63 = vector.extract_strided_slice %29 {offsets = [0, 64], sizes = [8, 64], strides = [1, 1]} : vector<8x128xbf16> to vector<8x64xbf16>
    %c0_24 = arith.constant 0 : index
    %c64 = arith.constant 64 : index
    %64 = vector.load %arg10[%c0_24, %c64] : memref<8x128xbf16, #tpu.memory_space<vmem>>, vector<8x64xbf16>
    %cst_25 = arith.constant dense<0.000000e+00> : vector<8x8xf32>
    %65 = tpu.matmul %63, %64, %cst_25 {dimension_numbers = #tpu.dot_dimension_numbers<[1], [1], [0], [0], [0, 0, 1, 0], [], []>} : vector<8x64xbf16>, vector<8x64xbf16>, vector<8x8xf32> -> vector<8x8xf32>
    %66 = vector.extract_strided_slice %30 {offsets = [0, 64], sizes = [8, 64], strides = [1, 1]} : vector<8x128xbf16> to vector<8x64xbf16>
    %cst_26 = arith.constant dense<0.000000e+00> : vector<8x8xf32>
    %67 = tpu.matmul %66, %36, %cst_26 {dimension_numbers = #tpu.dot_dimension_numbers<[1], [1], [0], [0], [0, 0, 1, 0], [], []>} : vector<8x64xbf16>, vector<8x64xbf16>, vector<8x8xf32> -> vector<8x8xf32>
    %68 = arith.addf %65, %67 : vector<8x8xf32>
    %cst_27 = arith.constant -1.000000e+09 : f32
    %69 = vector.broadcast %cst_27 : f32 to vector<8x8xf32>
    %70 = arith.select %35, %68, %69 : vector<8x8xi1>, vector<8x8xf32>
    %cst_28 = arith.constant dense<0xFF800000> : vector<8xf32>
    %71 = vector.multi_reduction <maximumf>, %70, %cst_28 [1] : vector<8x8xf32> to vector<8xf32>
    %72 = vector.shape_cast %71 : vector<8xf32> to vector<8x1xf32>
    %73 = vector.broadcast %72 : vector<8x1xf32> to vector<8x8xf32>
    %74 = arith.subf %70, %73 : vector<8x8xf32>
    %75 = math.exp %74 : vector<8x8xf32>
    %cst_29 = arith.constant dense<0.000000e+00> : vector<8xf32>
    %76 = vector.multi_reduction <add>, %75, %cst_29 [1] : vector<8x8xf32> to vector<8xf32>
    %77 = vector.shape_cast %76 : vector<8xf32> to vector<8x1xf32>
    %78 = tpu.reciprocal %77 {approx = true} : vector<8x1xf32> -> vector<8x1xf32>
    %79 = vector.broadcast %78 : vector<8x1xf32> to vector<8x8xf32>
    %80 = arith.mulf %75, %79 : vector<8x8xf32>
    %81 = arith.truncf %80 : vector<8x8xf32> to vector<8x8xbf16>
    %c0_30 = arith.constant 0 : index
    %c64_31 = arith.constant 64 : index
    %82 = vector.load %arg12[%c0_30, %c64_31] : memref<8x128xbf16, #tpu.memory_space<vmem>>, vector<8x64xbf16>
    %cst_32 = arith.constant dense<0.000000e+00> : vector<8x64xf32>
    %83 = tpu.matmul %81, %82, %cst_32 {dimension_numbers = #tpu.dot_dimension_numbers<[1], [0], [0], [1], [0, 0, 1, 1], [], []>} : vector<8x8xbf16>, vector<8x64xbf16>, vector<8x64xf32> -> vector<8x64xf32>
    %84 = arith.truncf %83 : vector<8x64xf32> to vector<8x64xbf16>
    %c64_33 = arith.constant 64 : index
    %c0_34 = arith.constant 0 : index
    %85 = vector.load %arg8[%c64_33, %c0_34] : memref<128x32xbf16, #tpu.memory_space<vmem>>, vector<64x32xbf16>
    %cst_35 = arith.constant dense<0.000000e+00> : vector<8x32xf32>
    %86 = tpu.matmul %84, %85, %cst_35 {dimension_numbers = #tpu.dot_dimension_numbers<[1], [0], [0], [1], [0, 0, 1, 1], [], []>} : vector<8x64xbf16>, vector<64x32xbf16>, vector<8x32xf32> -> vector<8x32xf32>
    %87 = arith.addf %62, %86 : vector<8x32xf32>
    %c0_36 = arith.constant 0 : index
    %c0_37 = arith.constant 0 : index
    %c0_38 = arith.constant 0 : index
    %88 = vector.load %arg9[%c0_36, %c0_37, %c0_38] : memref<1x8x32xf32, #tpu.memory_space<vmem>>, vector<1x8x32xf32>
    %89 = vector.shape_cast %88 : vector<1x8x32xf32> to vector<8x32xf32>
    %90 = vector.shape_cast %87 : vector<8x32xf32> to vector<1x8x32xf32>
    tpu.vector_store %arg9[%c0_36, %c0_37, %c0_38], %90 {strides = array<i32>} : memref<1x8x32xf32, #tpu.memory_space<vmem>>, vector<1x8x32xf32>,
    return
  }
  func.func @transform_0(%arg0: i32, %arg1: i32) -> (i32, i32, i32) {
    %c0_i32 = arith.constant 0 : i32
    %c0_i32_0 = arith.constant 0 : i32
    %c0_i32_1 = arith.constant 0 : i32
    return %arg0, %c0_i32, %c0_i32_0 : i32, i32, i32
  }
  func.func @transform_1(%arg0: i32, %arg1: i32) -> (i32, i32) {
    %c0_i32 = arith.constant 0 : i32
    %c0_i32_0 = arith.constant 0 : i32
    %c0_i32_1 = arith.constant 0 : i32
    return %c0_i32, %c0_i32_0 : i32, i32
  }
  func.func @transform_2(%arg0: i32, %arg1: i32) -> (i32, i32) {
    %c0_i32 = arith.constant 0 : i32
    %c0_i32_0 = arith.constant 0 : i32
    %c0_i32_1 = arith.constant 0 : i32
    return %c0_i32, %c0_i32_0 : i32, i32
  }
  func.func @transform_3(%arg0: i32, %arg1: i32) -> (i32, i32) {
    %c0_i32 = arith.constant 0 : i32
    %c0_i32_0 = arith.constant 0 : i32
    %c0_i32_1 = arith.constant 0 : i32
    return %c0_i32, %c0_i32_0 : i32, i32
  }
  func.func @transform_4(%arg0: i32, %arg1: i32) -> (i32, i32) {
    %c0_i32 = arith.constant 0 : i32
    %c0_i32_0 = arith.constant 0 : i32
    %c0_i32_1 = arith.constant 0 : i32
    return %c0_i32, %c0_i32_0 : i32, i32
  }
  func.func @transform_5(%arg0: i32, %arg1: i32) -> (i32, i32) {
    %c0_i32 = arith.constant 0 : i32
    %c0_i32_0 = arith.constant 0 : i32
    %c0_i32_1 = arith.constant 0 : i32
    return %c0_i32, %c0_i32_0 : i32, i32
  }
  func.func @transform_6(%arg0: i32, %arg1: i32) -> (i32, i32) {
    %c0_i32 = arith.constant 0 : i32
    %c0_i32_0 = arith.constant 0 : i32
    %c0_i32_1 = arith.constant 0 : i32
    return %c0_i32, %c0_i32_0 : i32, i32
  }
  func.func @transform_7(%arg0: i32, %arg1: i32) -> (i32, i32, i32) {
    %c0_i32 = arith.constant 0 : i32
    %c0_i32_0 = arith.constant 0 : i32
    return %arg0, %arg1, %c0_i32 : i32, i32, i32
  }
}

</mosaic_0001>

<bundles_post_ra>
// kernel: tpu_custom_call.1
= control target key start
LH: loop header
LB: loop body
LE: loop exit
PB: predicated region body
PF: predicated region fallthrough
CT: control target
= control target key end

     0   :  { %12 = vsyncpa [#allocation6], 0  ;;  %s2042_s0 = inlined_call_operand.vmem [shape: f32[2,8,32], index: 0, kind: input, shape index: {}]   ;;  %s2043_s1 = inlined_call_operand.hbm [shape: f32[8,128], index: 1, kind: input, shape index: {}]   ;;  %s2044_s2 = inlined_call_operand.hbm [shape: f32[8,128], index: 2, kind: input, shape index: {}]   ;;  %s2045_s3 = inlined_call_operand.vmem [shape: bf16[32,256], index: 3, kind: input, shape index: {}]   ;;  %s2046_s4 = inlined_call_operand.vmem [shape: bf16[32,192], index: 4, kind: input, shape index: {}]   ;;  %s2047_s5 = inlined_call_operand.hbm [shape: bf16[128,256], index: 5, kind: input, shape index: {}]   ;;  %s2048_s6 = inlined_call_operand.vmem [shape: bf16[128,32], index: 6, kind: input, shape index: {}]   ;;  %s2049_s7 = inlined_call_operand.hbm [shape: f32[2,8,32], index: 7, kind: output, shape index: {}]  }
   0x1   :  { %13 = vsyncpa [#allocation9], 0 }
   0x2   :  { %14 = vsyncpa [#allocation7], 0 }
   0x3   :  { %16 = vsyncpa [#allocation7 + $0x1], 0  ;;  %s1767_s24 = smov 0   ;;  %s1769_s25 = smov 0  }
   0x4   :  { %s1771_s26 = smov 0   ;;  %s1773_s27 = smov 0  }
   0x5   :  { %s1775_s28 = smov 0   ;;  %s1777_s29 = smov 0  }
   0x6 LB: > { %s1260_s30 = sadd.s32 4294967295, %s1713_s29   ;;  %s1261_s8 = sadd.s32 4294967294, %s1713_s29   ;;  %s1713_s29 = sphi %s1777_s29, %s22_s29   ;;  %s1709_s28 = sphi %s1775_s28, %s2067_s28   ;;  %s1705_s27 = sphi %s1773_s27, %s2066_s27   ;;  %s1701_s26 = sphi %s1771_s26, %s2065_s26   ;;  %s1697_s25 = sphi %s1769_s25, %s2064_s25   ;;  %s1693_s24 = sphi %s1767_s24, %s2063_s24  }
   0x7   : > { %s34_s9 = sadd.s32 1, %s1709_s28  ;;  %s195_s10 = sadd.s32 1, %s1701_s26 }
   0x8   : > { %p36_p0 = scmp.ge.s32.totalorder %s34_s9, 2  ;;  %p205_p1 = scmp.ne.s32.totalorder %s1701_s26, %s1697_s25 }
   0x9   : > { %p206_p2 = scmp.eq.s32.totalorder %s1260_s30, 1  ;;  %p211_p3 = scmp.ne.s32.totalorder %s1697_s25, %s1693_s24 }
   0xa   : > { %s2069_s9 = smov (%p36_p0, %s34_s9), 0  ;;  %p212_p5 = scmp.eq.s32.totalorder %s1261_s8, 1 }
   0xb   : > { %p1807_p4 = por %p206_p2, %p205_p1  ;;  %s190_s12 = ssub.s32 %s1709_s28, %s2069_s9 }
   0xc   : > { %p1262_p6 = scmp.ge.s32.totalorder %s1713_s29, 1  ;;  %p193_p7 = scmp.eq.s32.totalorder %s190_s12, 0 }
   0xd   : > { %s2054_s11 = scalar_select %p1807_p4, 1, 0 }
   0xe   : > { %p1814_p8 = por %p212_p5, %p211_p3  ;;  %p219_p9 = scmp.lt.s32.totalorder %s1713_s29, 3 }
   0xf   : > { %s1820_s14 = scalar_select %p193_p7, %s1701_s26, %s195_s10  }
  0x10   : > { %s2055_s13 = scalar_select %p1814_p8, 1, 0 }
  0x11   : > { %p1822_p10 = pnand %p1262_p6, %p219_p9  ;;  %p1826_p11 = scmp.eq.s32.totalorder %s1260_s30, 0 }
  0x12   : > { %s1715_s17 = smov [#allocation8]   ;;  %s1716_s20 = smov [#allocation5]  }
  0x13   : > { %s2056_s15 = scalar_select %p1822_p10, 1, 0 }
  0x14   : > { %s2057_s16 = scalar_select %p1826_p11, 1, 0 }
  0x15   : > { %p1417_p12 = pneg %p1822_p10  ;;  %s243_s18 = sshll.u32 %s1715_s17, 4  ;;  %s244_s18 = int_to_ptr.vmem [resolvable:$true] %s243_s18 }
  0x16   : > { %s232_s21 = sshll.u32 %s1716_s20, 4  ;;  %s1562_s22 = scalar_lea.vmem %s244_s18, 128  ;;  %s233_s21 = int_to_ptr.vmem [resolvable:$true] %s232_s21 }
  0x17   : > { %p1834_p13 = pnand %p1826_p11, %p1417_p12  ;;  %p1563_p1 = scmp.ne.s32.totalorder %s244_s18, %s1562_s22 }
  0x18   : > { %p1570_p5 = scmp.lt.s32.totalorder %s244_s18, %s244_s18  ;;  %p1571_p6 = scmp.lt.s32.totalorder %s1562_s22, %s1562_s22 }
  0x19   : > { %p1553_p0 = pneg %p1834_p13 }
  0x1a   : > { %p1572_p7 = por %p1571_p6, %p1570_p5 }
  0x1b   : > { %p1565_p2 = pnand %p1563_p1, %p1553_p0 }
  0x1d   : > { %p1566_p3 = pneg %p1565_p2 }
  0x1f   : > { %p1573_p9 = pnand %p1572_p7, %p1566_p3 }
  0x21   : > { %1576 = shalt.err (!%p1573_p9)
}
  0x22   : > { %1423 = dma.hbm_to_vmem [thread:$0]  (!%p1834_p13), %s2044_s2, 128, %s244_s18, [#allocation9]  }
  0x23   : > { %s1588_s8 = scalar_lea.vmem %s233_s21, 128  ;;  %p1596_p1 = scmp.lt.s32.totalorder %s233_s21, %s233_s21 }
  0x24   : > { %p1589_p12 = scmp.ne.s32.totalorder %s233_s21, %s1588_s8  ;;  %p1597_p2 = scmp.lt.s32.totalorder %s1588_s8, %s1588_s8 }
  0x26   : > { %p1591_p8 = pnand %p1589_p12, %p1553_p0  ;;  %p1598_p11 = por %p1597_p2, %p1596_p1 }
  0x28   : > { %p1592_p4 = pneg %p1591_p8 }
  0x2a   : > { %p1599_p10 = pnand %p1598_p11, %p1592_p4 }
  0x2c   : > { %1602 = shalt.err (!%p1599_p10)
}
  0x2d   : > { %1420 = dma.hbm_to_vmem [thread:$0]  (!%p1834_p13), %s2043_s1, 128, %s233_s21, [#allocation6]  }
  0x2e   : > { %s1717_s17 = smov [#allocation10]  }
  0x2f   : > { %s259_s18 = sshll.u32 %s1717_s17, 4  ;;  %s260_s18 = int_to_ptr.vmem [resolvable:$true] %s259_s18 }
  0x30   : > { %s1614_s20 = scalar_lea.vmem %s260_s18, 2048  ;;  %p1622_p6 = scmp.lt.s32.totalorder %s260_s18, %s260_s18 }
  0x31   : > { %p1615_p3 = scmp.ne.s32.totalorder %s260_s18, %s1614_s20  ;;  %p1623_p7 = scmp.lt.s32.totalorder %s1614_s20, %s1614_s20 }
  0x33   : > { %p1617_p8 = pnand %p1615_p3, %p1553_p0  ;;  %p1624_p4 = por %p1623_p7, %p1622_p6 }
  0x35   : > { %p1618_p5 = pneg %p1617_p8 }
  0x37   : > { %p1625_p10 = pnand %p1624_p4, %p1618_p5 }
  0x39   : > { %1628 = shalt.err (!%p1625_p10)
}
  0x3a   : > { %s1718_s22 = smov 128   ;;  %s1719_s23 = smov 8  }
  0x3b   : > { %1426 = dma.hbm_to_vmem [thread:$0]  (!%p1834_p13), %s2047_s5, 2048, %s260_s18, [#allocation9], %s1718_s22, %s1718_s22, %s1719_s23  }
  0x3c   : > { %p2059_p11 = scmp.ne.s32.totalorder %s2056_s15, 0 }
  0x3d   : > { %p2060_p9 = scmp.ne.s32.totalorder (!%p2059_p11), %s2057_s16, 0 }
  0x3e   : > { %285 = sbr.rel (%p2059_p11) target bundleno = 1918 (0x77e), region = 48 }
  0x43   : > { %1680 = dma.done.wait (%p2060_p9), [#allocation6], 128  }
  0x44   : > { %1682 = vsyncadd (%p2060_p9), [#allocation6], 4294967168 }
  0x45   : > { %1684 = dma.done.wait (%p2060_p9), [#allocation9], 2176  }
  0x46   : > { %1686 = vsyncadd (%p2060_p9), [#allocation9], 4294965120  ;;  %p324_p0 = scmp.lt.s32.totalorder %s1705_s27, 1  ;;  %v1720_v0 = vmov 0   ;;  %v1497_v1 = vld [vmem:[%s2046_s4 + $0x14] ss:$8 sps:$4 sm:$0xff]  }
  0x47   : > { %395 = vmatprep.mubr.bf16.mxu0 %v1720_v0  ;;  %551 = vmatprep.mubr.bf16.mxu1 %v1720_v0  ;;  %v1499_v2 = vld [vmem:[%s2046_s4 + $0x10] ss:$8 sps:$4 sm:$0xff]   ;;  %v1500_v3 = vld [vmem:[%s2046_s4 + $0x4] ss:$8 sps:$4 sm:$0xff]   ;;  %v1502_v4 = vld [vmem:[%s2046_s4] ss:$8 sps:$4 sm:$0xff]  }
  0x48   : > { %s325_s15 = scalar_select %p324_p0, %s1705_s27, 1  ;;  %375 = vmatprep.subr.bf16.mxu0 %v1497_v1  ;;  %v1505_v6 = vld [vmem:[%s2045_s3 + $0x14] ss:$8 sps:$4 sm:$0xff]   ;;  %v1503_v7 = vld [vmem:[%s2045_s3 + $0x10] ss:$8 sps:$4 sm:$0xff]   ;;  %vm359_vm0 = vcmask 261120  }
  0x49   : > { %376 = vmatpush1.bf16.msra.mxu0 %v1499_v2  ;;  %v1509_v9 = vld [vmem:[#allocation10 + $0x74] ss:$8 sps:$4 sm:$0xff]   ;;  %v1511_v10 = vld [vmem:[#allocation10 + $0x70] ss:$8 sps:$4 sm:$0xff]   ;;  %v1512_v11 = vld [vmem:[#allocation10 + $0x64] ss:$8 sps:$4 sm:$0xff]  }
  0x4a   : > { %s1272_s19 = sshll.u32 %s325_s15, 3  ;;  %377 = vmatprep.subr.bf16.mxu0 %v1500_v3  ;;  %v1508_v12 = vld [vmem:[%s2045_s3 + $0x4] ss:$8 sps:$4 sm:$0xff]   ;;  %519 = vmatprep.subr.bf16.mxu1 %v1509_v9  ;;  %v1515_v14 = vld [vmem:[#allocation10 + $0x54] ss:$8 sps:$4 sm:$0xff]   ;;  %s1721_s22 = smov 96  }
  0x4b   : > { %s327_s18 = scalar_lea.vmem %s2042_s0, %s1272_s19  ;;  %520 = vmatpush1.bf16.msra.mxu1 %v1511_v10  ;;  %v1514_v13 = vld [vmem:[#allocation10 + $0x60] ss:$8 sps:$4 sm:$0xff]   ;;  %v1506_v15 = vld [vmem:[%s2045_s3] ss:$8 sps:$4 sm:$0xff]   ;;  %v1517_v16 = vld [vmem:[#allocation10 + $0x50] ss:$8 sps:$4 sm:$0xff]   ;;  %v660_v10 = vlaneseq }
  0x4c   : > { %v333_v5 = vld [vmem:[%s327_s18] sm:$0xff]  ;;  %521 = vmatprep.subr.bf16.mxu1 %v1512_v11  ;;  %v1521_v19 = vld [vmem:[#allocation10 + $0x34] ss:$8 sps:$4 sm:$0xff]   ;;  %v1523_v20 = vld [vmem:[#allocation10 + $0x30] ss:$8 sps:$4 sm:$0xff]   ;;  %s1722_s16 = smov 32  }
  0x4d   : > { %v334_v8 = vpack.c.bf16 %v333_v5, %v333_v5  ;;  %378 = vmatpush1.bf16.msra.mxu0 %v1502_v4  ;;  %v1518_v17 = vld [vmem:[#allocation10 + $0x44] ss:$8 sps:$4 sm:$0xff]   ;;  %v1520_v18 = vld [vmem:[#allocation10 + $0x40] ss:$8 sps:$4 sm:$0xff]   ;;  %v1527_v23 = vld [vmem:[#allocation10 + $0x14] ss:$8 sps:$4 sm:$0xff]  }
  0x4e   : > { %608 = vmatprep.subr.bf16.mxu0 %v1505_v6  ;;  %v1524_v21 = vld [vmem:[#allocation10 + $0x24] ss:$8 sps:$4 sm:$0xff]   ;;  %v1526_v22 = vld [vmem:[#allocation10 + $0x20] ss:$8 sps:$4 sm:$0xff]   ;;  %v1529_v24 = vld [vmem:[#allocation10 + $0x10] ss:$8 sps:$4 sm:$0xff]  }
  0x4f   : > { %522 = vmatpush1.bf16.msra.mxu1 %v1514_v13  ;;  %v1530_v25 = vld [vmem:[#allocation10 + $0x4] ss:$8 sps:$4 sm:$0xff]   ;;  %v1532_v26 = vld [vmem:[#allocation10] ss:$8 sps:$4 sm:$0xff]   ;;  %v1723_v36 = vmov 0.0   ;;  %vm1724_vm1 = vmmov 0  }
  0x50   : > { %1277 = vmatmul.mubr.msk.bf16.vlgmr.msra.gmra.mxu0 %vm359_vm0, %v334_v8  ;;  %523 = vmatprep.subr.bf16.mxu1 %v1515_v14  ;;  %v404_v40 = vld [vmem:[#allocation5] sm:$0xff]  ;;  %v405_v41 = vld [vmem:[#allocation8] sm:$0xff]  ;;  %vm420_vm2 = vcmask 519168   ;;  %vm651_vm3 = vcmask 523264   ;;  %vm653_vm4 = vcmask 785408   ;;  %vm779_vm5 = vcmask 1043456  }
  0x51   : > { %609 = vmatpush1.bf16.msra.mxu0 %v1503_v7  ;;  %628 = vmatprep.mubr.bf16.mxu0 %v1720_v0  ;;  %v661_v11 = vshrl.u32 %v660_v10, 7  ;;  %vm762_vm7 = vcmask 64512   ;;  %s1725_s23 = smov 64   ;;  %s321_s8 = sand.u32 1, %s1697_s25  }
  0x52   : > { %610 = vmatprep.subr.bf16.mxu0 %v1508_v12  ;;  %v665_v12 = vand.u32 127, %v660_v10  ;;  %s1271_s19 = sshll.u32 %s321_s8, 3  ;;  %s1318_s10 = sshll.u32 %s1705_s27, 7 }
  0x53   : > { %524 = vmatpush1.bf16.msra.mxu1 %v1517_v16  ;;  %s323_s12 = scalar_lea.vmem [#allocation11], %s1271_s19  ;;  %p2061_p12 = scmp.ne.s32.totalorder %s2054_s11, 0 }
  0x54   : > { %525 = vmatprep.subr.bf16.mxu1 %v1518_v17  ;;  %vm666_vm6 = vcmp.ge.s32.totalorder %v661_v11, %v665_v12  ;;  %s1155_s17 = sshll.u32 %s323_s12, 4  ;;  %s1997_s17 = int_to_ptr.vmem [resolvable:$true] %s1155_s17 }
  0x55   : > { %611 = vmatpush1.bf16.msra.mxu0 %v1506_v15  ;;  %s1629_s27 = scalar_lea.vmem %s1997_s17, 128 }
  0x56   : > { %1343 = vmatprep.subr.bf16.mxu0 %v1723_v36  ;;  %p1630_p13 = scmp.ne.s32.totalorder %s1997_s17, %s1629_s27 }
  0x57   : > { %526 = vmatpush1.bf16.msra.mxu1 %v1520_v18 }
  0x58   : > { %1298 = vmatmul.mubr.msk.bf16.vlgmr.msra.gmra.mxu0 %vm359_vm0, %v334_v8  ;;  %527 = vmatprep.subr.bf16.mxu1 %v1521_v19  ;;  %p1631_p1 = pnand %p1630_p13, %p2061_p12 }
  0x59   : > { %1345 = vmatprep.mubr.msk.bf16.mxu0 %vm1724_vm1, %v1723_v36 }
  0x5a   : > { %p1632_p2 = pneg %p1631_p1 }
  0x5b   : > { %528 = vmatpush1.bf16.msra.mxu1 %v1523_v20 }
  0x5c   : > { %529 = vmatprep.subr.bf16.mxu1 %v1524_v21 }
  0x5f   : > { %530 = vmatpush1.bf16.msra.mxu1 %v1526_v22 }
  0x60   : > { %531 = vmatprep.subr.bf16.mxu1 %v1527_v23 }
  0x63   : > { %532 = vmatpush1.bf16.msra.mxu1 %v1529_v24 }
  0x64   : > { %533 = vmatprep.subr.bf16.mxu1 %v1530_v25 }
  0x67   : > { %534 = vmatpush1.bf16.msra.mxu1 %v1532_v26 }
  0x68   : > { %1361 = vmatprep.subr.bf16.mxu1 %v1723_v36 }
 0x110   : > { %v397_v27 = vpop.f32.mrf.mxu0 }
 0x111   : > { %v422_v28 = vpack.c.bf16 %v397_v27, %v397_v27 }
 0x112   : > { %v399_v29 = vpop.f32.mrf.mxu0 }
 0x113   : > { %552 = vmatmul.mubr.bf16.vlgmr.msra.gmra.mxu1 %v422_v28  ;;  %v407_v30 = vsub.f32 0.0, %v399_v29  ;;  %v406_v44 = vmul.f32 %v404_v40, %v399_v29 }
 0x114   : > { %v401_v31 = vpop.f32.mrf.mxu0  ;;  %1363 = vmatprep.mubr.msk.bf16.mxu1 %vm1724_vm1, %v1723_v36 }
 0x115   : > { %409 = vrot.lane.b32.xlu0 %v407_v30, %s1721_s22 }
 0x116   : > { %v402_v32 = vpop.f32.mrf.mxu0 }
 0x118   : > { %v630_v33 = vpop.f32.mrf.mxu0 }
 0x119   : > { %413 = vrot.lane.b32.xlu0 %v399_v29, %s1722_s16  ;;  %v658_v4 = vpack.c.bf16 %v630_v33, %v630_v33 }
 0x11a   : > { %v632_v34 = vpop.f32.mrf.mxu0 }
 0x11b   : > { %v641_v35 = vsub.f32 0.0, %v632_v34  ;;  %v655_v55 = vmul.f32 %v632_v34, %v404_v40 }
 0x11c   : > { %v634_v37 = vpop.f32.mrf.mxu0 }
 0x11d   : > { %643 = vrot.lane.b32.xlu1 %v641_v35, %s1721_s22  ;;  %s1995_s22 = scalar_lea.hbm %s2049_s7, %s1318_s10 }
 0x11e   : > { %v635_v38 = vpop.f32.mrf.mxu0 }
 0x121   : > { %647 = vrot.lane.b32.xlu1 %v632_v34, %s1722_s16  ;;  %s1141_s16 = scalar_lea.sflag [#allocation7], %s321_s8 }
 0x187   : > { %v410_v39 = vpop.permute.xlu0 %409 }
 0x18b   : > { %v414_v42 = vpop.permute.xlu0 %413 }
 0x18c   : > { %v416_v43 = vsel %vm359_vm0, %v410_v39, %v414_v42 }
 0x18d   : > { %v417_v45 = vmul.f32 %v416_v43, %v405_v41 }
 0x18f   : > { %v418_v46 = vadd.f32 %v417_v45, %v406_v44  ;;  %v644_v47 = vpop.permute.xlu1 %643 }
 0x191   : > { %v419_v48 = vpack.c.bf16 %v418_v46, %v418_v46 }
 0x193   : > { %421 = vst.msk [vmem:[#allocation3] sm:$0xf] %vm420_vm2, %v419_v48  ;;  %v648_v49 = vpop.permute.xlu1 %647 }
 0x194   : > { %v650_v50 = vsel %vm359_vm0, %v644_v47, %v648_v49 }
 0x195   : > { %v652_v51 = vsel %vm651_vm3, %v650_v50, %v644_v47 }
 0x196   : > { %v654_v52 = vsel %vm653_vm4, %v652_v51, %v648_v49 }
 0x197   : > { %v656_v53 = vmul.f32 %v654_v52, %v405_v41 }
 0x199   : > { %v657_v57 = vadd.f32 %v656_v53, %v655_v55 }
 0x19a   : > { %v667_v54 = vld [vmem:[#allocation3] sm:$0xf] }
 0x19b   : > { %v673_v56 = vsel %vm651_vm3, %v667_v54, 0  ;;  %v659_v58 = vpack.c.bf16 %v657_v57, %v657_v57  ;;  %v1540_v57 = vld [vmem:[%s2048_s6 + $0x30] sm:$0xff]  }
 0x19c   : > { %1344 = vmatpush3.bf16.xpose.msra.mxu0 %v673_v56  ;;  %1362 = vmatpush3.bf16.xpose.msra.mxu1 %v673_v56  ;;  %v1539_v56 = vld [vmem:[%s2048_s6 + $0x38] sm:$0xff]  }
 0x19d   : > { %1349 = vmatprep.subr.bf16.mxu0 %v1723_v36  ;;  %1373 = vmatprep.subr.bf16.mxu1 %v1723_v36 }
 0x1a3   : > { %1346 = vmatmul.mubr.msk.bf16.vlgmr.msra.gmra.mxu0 %vm651_vm3, %v659_v58 }
 0x1a4   : > { %1351 = vmatprep.mubr.msk.bf16.mxu0 %vm1724_vm1, %v1723_v36 }
 0x1d3   : > { %v553_v59 = vpop.f32.mrf.mxu1 }
 0x1d4   : > { %v560_v60 = vpack.c.bf16 %v553_v59, %v553_v59 }
 0x1d5   : > { %v555_v61 = vpop.f32.mrf.mxu1 }
 0x1d6   : > { %561 = vst [vmem:[#allocation2] sm:$0xf] %v560_v60  ;;  %v562_v62 = vpack.c.bf16 %v555_v61, %v555_v61 }
 0x1d7   : > { %v557_v63 = vpop.f32.mrf.mxu1 }
 0x1d8   : > { %563 = vst [vmem:[#allocation4] sm:$0xf] %v562_v62 }
 0x1d9   : > { %v558_v0 = vpop.f32.mrf.mxu1 }
 0x1da   : > { %v1535_v0 = vld [vmem:[%s2048_s6 + $0x18] sm:$0xff]  }
 0x1dd   : > { %v668_v1 = vld [vmem:[#allocation2] sm:$0xf] }
 0x1de   : > { %v719_v2 = vsel %vm651_vm3, %v668_v1, 0  ;;  %v1303_v20 = vcombine.low %v668_v1, %v668_v1 }
 0x1df   : > { %1350 = vmatpush3.bf16.xpose.msra.mxu0 %v719_v2  ;;  %v1922_v3 = vld [vmem:[#allocation4] sm:$0xf]  ;;  %v1536_v2 = vld [vmem:[%s2048_s6 + $0x10] sm:$0xff]  }
 0x1e0   : > { %1355 = vmatprep.subr.bf16.mxu0 %v1723_v36  ;;  %v781_v5 = vsel %vm779_vm5, %v1922_v3, 0  ;;  %v1305_v55 = vcombine.low %v1922_v3, %v1922_v3  ;;  %v1537_v3 = vld [vmem:[%s2048_s6 + $0x8] sm:$0xff]  }
 0x1e6   : > { %1352 = vmatmul.mubr.msk.bf16.vlgmr.msra.gmra.mxu0 %vm651_vm3, %v658_v4 }
 0x1e7   : > { %1356 = vmatpush3.bf16.msra.mxu0 %v781_v5  ;;  %1357 = vmatprep.mubr.msk.bf16.mxu0 %vm1724_vm1, %v1723_v36 }
 0x1e8   : > { %1367 = vmatprep.subr.bf16.mxu0 %v1723_v36 }
 0x263   : > { %v709_v6 = vpop.f32.mrf.mxu0 }
 0x265   : > { %v1347_v7 = vpop.f32.mrf.mxu0 }
 0x267   : > { %v712_v8 = vpop.f32.mrf.mxu0 }
 0x269   : > { %v1348_v9 = vpop.f32.mrf.mxu0 }
 0x2a6   : > { %v755_v13 = vpop.f32.mrf.mxu0 }
 0x2a7   : > { %v756_v14 = vadd.f32 %v755_v13, %v709_v6  ;;  %v1542_v6 = vld [vmem:[%s2048_s6 + $0x20] sm:$0xff]  }
 0x2a8   : > { %v1353_v15 = vpop.f32.mrf.mxu0 }
 0x2a9   : > { %v761_v16 = vsel %vm666_vm6, %v756_v14, -1e+09 }
 0x2aa   : > { %v758_v17 = vpop.f32.mrf.mxu0  ;;  %v763_v18 = vsel %vm762_vm7, %v761_v16, -inf }
 0x2ab   : > { %764 = vmax.xlane.f32.xlu0 %v763_v18 }
 0x2ac   : > { %v1354_v19 = vpop.f32.mrf.mxu0 }
 0x2c1   : > { %884 = vrot.lane.b32.xlu0 %v1303_v20, %s1725_s23 }
 0x2c5   : > { %879 = vrot.lane.b32.xlu0 %v658_v4, %s1725_s23  ;;  %v1538_v4 = vld [vmem:[%s2048_s6] sm:$0xff]  }
 0x334   : > { %v765_v21 = vpop.xlane.xlu0 %764 }
 0x335   : > { %v766_v22 = vsub.f32 %v761_v16, %v765_v21 }
 0x337   : > { %v767_v23 = vmul.f32 1.442695, %v766_v22 }
 0x338   : > { %v885_v30 = vpop.permute.xlu0 %884 }
 0x339   : > { %1543 = vpow2.f32 %v767_v23  ;;  %v890_v32 = vsel %vm651_vm3, %v885_v30, 0 }
 0x33c   : > { %v880_v33 = vpop.permute.xlu0 %879 }
 0x346   : > { %v1544_v24 = vpop.eup %1543 }
 0x347   : > { %v769_v25 = vsel %vm762_vm7, %v1544_v24, 0.0 }
 0x348   : > { %770 = vadd.xlane.f32.xlu1 %v769_v25 }
 0x359   : > { %833 = vrot.lane.b32.xlu1 %v659_v58, %s1725_s23  ;;  %v1541_v58 = vld [vmem:[%s2048_s6 + $0x28] sm:$0xff]  }
 0x3d1   : > { %v771_v26 = vpop.xlane.xlu1 %770 }
 0x3d2   : > { %1545 = vrcp.f32 %v771_v26 }
 0x3d5   : > { %v834_v27 = vpop.permute.xlu1 %833 }
 0x3d6   : > { %1364 = vmatmul.mubr.msk.bf16.vlgmr.msra.gmra.mxu1 %vm651_vm3, %v834_v27 }
 0x3d7   : > { %1375 = vmatprep.mubr.msk.bf16.mxu1 %vm1724_vm1, %v1723_v36 }
 0x3df   : > { %v1546_v28 = vpop.eup %1545 }
 0x3e0   : > { %v773_v29 = vmul.f32 %v1546_v28, %v1544_v24 }
 0x3e2   : > { %v774_v31 = vpack.c.bf16 %v773_v29, %v773_v29 }
 0x3e4   : > { %1358 = vmatmul.mubr.msk.bf16.vlgmr.msra.gmra.mxu0 %vm762_vm7, %v774_v31 }
 0x3e5   : > { %1368 = vmatpush3.bf16.xpose.msra.mxu0 %v890_v32  ;;  %1369 = vmatprep.mubr.msk.bf16.mxu0 %vm1724_vm1, %v1723_v36 }
 0x3e6   : > { %1379 = vmatprep.subr.bf16.mxu0 %v1723_v36 }
 0x3ec   : > { %1370 = vmatmul.mubr.msk.bf16.vlgmr.msra.gmra.mxu0 %vm651_vm3, %v880_v33 }
 0x3ed   : > { %1387 = vmatprep.mubr.msk.bf16.mxu0 %vm1724_vm1, %v1723_v36  ;;  %1380 = vmatpush3.bf16.msra.mxu0 %v1539_v56 }
 0x3ee   : > { %1381 = vmatprep.subr.bf16.mxu0 %v1723_v36 }
 0x3f1   : > { %1382 = vmatpush3.bf16.msra.mxu0 %v1540_v57 }
 0x3f2   : > { %1383 = vmatprep.subr.bf16.mxu0 %v1723_v36 }
 0x3f5   : > { %1384 = vmatpush3.bf16.msra.mxu0 %v1541_v58 }
 0x3f6   : > { %1385 = vmatprep.subr.bf16.mxu0 %v1723_v36 }
 0x3f9   : > { %1386 = vmatpush3.bf16.msra.mxu0 %v1542_v6 }
 0x496   : > { %v872_v34 = vpop.f32.mrf.mxu1 }
 0x498   : > { %v1365_v35 = vpop.f32.mrf.mxu1 }
 0x49a   : > { %v875_v37 = vpop.f32.mrf.mxu1 }
 0x49c   : > { %v1366_v38 = vpop.f32.mrf.mxu1 }
 0x4a4   : > { %v817_v39 = vpop.f32.mrf.mxu0 }
 0x4a5   : > { %v823_v5 = vpack.c.bf16 %v817_v39, %v817_v39 }
 0x4a6   : > { %v1359_v40 = vpop.f32.mrf.mxu0 }
 0x4a8   : > { %v820_v41 = vpop.f32.mrf.mxu0 }
 0x4aa   : > { %v1360_v42 = vpop.f32.mrf.mxu0 }
 0x4ac   : > { %v926_v43 = vpop.f32.mrf.mxu0 }
 0x4ad   : > { %v927_v44 = vadd.f32 %v926_v43, %v872_v34 }
 0x4ae   : > { %v1371_v45 = vpop.f32.mrf.mxu0 }
 0x4af   : > { %v932_v46 = vsel %vm666_vm6, %v927_v44, -1e+09 }
 0x4b0   : > { %v929_v47 = vpop.f32.mrf.mxu0  ;;  %v933_v48 = vsel %vm762_vm7, %v932_v46, -inf }
 0x4b1   : > { %934 = vmax.xlane.f32.xlu1 %v933_v48 }
 0x4b2   : > { %v1372_v49 = vpop.f32.mrf.mxu0 }
 0x53a   : > { %v935_v50 = vpop.xlane.xlu1 %934 }
 0x53b   : > { %v936_v51 = vsub.f32 %v932_v46, %v935_v50 }
 0x53d   : > { %v937_v52 = vmul.f32 1.442695, %v936_v51 }
 0x53f   : > { %1547 = vpow2.f32 %v937_v52 }
 0x54c   : > { %v1548_v53 = vpop.eup %1547 }
 0x54d   : > { %v939_v54 = vsel %vm762_vm7, %v1548_v53, 0.0 }
 0x54e   : > { %940 = vadd.xlane.f32.xlu0 %v939_v54 }
 0x564   : > { %948 = vrot.lane.b32.xlu0 %v1305_v55, %s1725_s23  ;;  %s1726_s23 = smov [#allocation11]  }
 0x565   : > { %s1633_s30 = sshll.u32 %s1726_s23, 4  ;;  %s1634_s30 = int_to_ptr.vmem [resolvable:$false] %s1633_s30 }
 0x566   : > { %s1635_s21 = scalar_lea.vmem %s1634_s30, 256  ;;  %p1636_p3 = scmp.lt.s32.totalorder %s1997_s17, %s1634_s30 }
 0x567   : > { %p1637_p8 = scmp.lt.s32.totalorder %s1635_s21, %s1629_s27 }
 0x569   : > { %p1638_p5 = por %p1637_p8, %p1636_p3 }
 0x56b   : > { %p1639_p6 = pnand %p1638_p5, %p1632_p2 }
 0x5d7   : > { %v941_v59 = vpop.xlane.xlu0 %940 }
 0x5d8   : > { %1549 = vrcp.f32 %v941_v59 }
 0x5db   : > { %v949_v60 = vpop.permute.xlu0 %948 }
 0x5dc   : > { %v954_v61 = vsel %vm779_vm5, %v949_v60, 0 }
 0x5dd   : > { %1374 = vmatpush3.bf16.msra.mxu1 %v954_v61 }
 0x5de   : > { %1391 = vmatprep.subr.bf16.mxu1 %v1723_v36 }
 0x5e5   : > { %v1550_v62 = vpop.eup %1549 }
 0x5e6   : > { %v943_v63 = vmul.f32 %v1550_v62, %v1548_v53 }
 0x5e8   : > { %v944_v1 = vpack.c.bf16 %v943_v63, %v943_v63 }
 0x5ea   : > { %1376 = vmatmul.mubr.msk.bf16.vlgmr.msra.gmra.mxu1 %vm762_vm7, %v944_v1 }
 0x5eb   : > { %1392 = vmatpush3.bf16.msra.mxu1 %v1535_v0  ;;  %1399 = vmatprep.mubr.msk.bf16.mxu1 %vm1724_vm1, %v1723_v36 }
 0x5ec   : > { %1393 = vmatprep.subr.bf16.mxu1 %v1723_v36 }
 0x5ef   : > { %1394 = vmatpush3.bf16.msra.mxu1 %v1536_v2 }
 0x5f0   : > { %1395 = vmatprep.subr.bf16.mxu1 %v1723_v36 }
 0x5f3   : > { %1396 = vmatpush3.bf16.msra.mxu1 %v1537_v3 }
 0x5f4   : > { %1397 = vmatprep.subr.bf16.mxu1 %v1723_v36 }
 0x5f7   : > { %1398 = vmatpush3.bf16.msra.mxu1 %v1538_v4 }
 0x5fa   : > { %1400 = vmatmul.mubr.msk.bf16.vlgmr.msra.gmra.mxu1 %vm651_vm3, %v823_v5 }
 0x6aa   : > { %v990_v7 = vpop.f32.mrf.mxu1 }
 0x6ab   : > { %v996_v8 = vpack.c.bf16 %v990_v7, %v990_v7 }
 0x6ac   : > { %v1377_v9 = vpop.f32.mrf.mxu1 }
 0x6ad   : > { %1388 = vmatmul.mubr.msk.bf16.vlgmr.msra.gmra.mxu0 %vm651_vm3, %v996_v8 }
 0x6ae   : > { %v993_v10 = vpop.f32.mrf.mxu1 }
 0x6b0   : > { %v1378_v11 = vpop.f32.mrf.mxu1 }
 0x6ba   : > { %v1133_v12 = vpop.f32.mrf.mxu1 }
 0x6bc   : > { %v1401_v36 = vpop.f32.mrf.mxu1 }
 0x6be   : > { %v1136_v13 = vpop.f32.mrf.mxu1 }
 0x6c0   : > { %v1402_v14 = vpop.f32.mrf.mxu1 }
 0x76d   : > { %v1066_v15 = vpop.f32.mrf.mxu0 }
 0x76e   : > { %v1134_v16 = vadd.f32 %v1133_v12, %v1066_v15 }
 0x76f   : > { %v1389_v17 = vpop.f32.mrf.mxu0 }
 0x770   : > { %1139 = vst.msk [vmem:[%s323_s12] sm:$0xff] %vm359_vm0, %v1134_v16 }
 0x771   : > { %v1069_v18 = vpop.f32.mrf.mxu0 }
 0x772   : > { %1642 = shalt.err (!%p1639_p6)
}
 0x773   : > { %s1643_s15 = scalar_lea.hbm %s1995_s22, 128  ;;  %s1647_s10 = scalar_lea.hbm %s2049_s7, 256 }
 0x774   : > { %p1644_p7 = scmp.ne.s32.totalorder %s1995_s22, %s1643_s15  ;;  %p1648_p11 = scmp.lt.s32.totalorder %s1995_s22, %s2049_s7 }
 0x775   : > { %p1649_p9 = scmp.lt.s32.totalorder %s1647_s10, %s1643_s15 }
 0x776   : > { %p1645_p4 = pnand %p1644_p7, %p2061_p12 }
 0x777   : > { %p1650_p0 = por %p1649_p9, %p1648_p11 }
 0x778   : > { %p1646_p10 = pneg %p1645_p4 }
 0x77a   : > { %p1651_p13 = pnand %p1650_p0, %p1646_p10 }
 0x77c   : > { %1654 = shalt.err (!%p1651_p13)
}
 0x77d   : > { %1415 = dma.vmem_to_hbm [thread:$0]  (%p2061_p12), %s1997_s17, 128, %s1995_s22, %s1141_s16   ;;  %v1390_v19 = vpop.f32.mrf.mxu0 }
 0x77e PF: > { %p1437_p1 = scmp.ge.s32.totalorder %s1713_s29, 2  ;;  %s1167_s20 = sand.u32 1, %s1693_s24  }
 0x77f   : > { %p2062_p2 = scmp.ne.s32.totalorder %s2055_s13, 0  ;;  %s1168_s27 = scalar_lea.sflag [#allocation7], %s1167_s20 }
 0x781   : > { %p1428_p3 = pnand %p1437_p1, %p2062_p2 }
 0x783   : > { %p1429_p8 = pneg %p1428_p3 }
 0x785   : > { %1688 = dma.done.wait (%p1429_p8), %s1168_s27, 128  }
 0x786   : > { %1690 = vsyncadd (%p1429_p8), %s1168_s27, 4294967168  ;;  %s22_s29 = sadd.s32 1, %s1713_s29   ;;  %s2063_s24 = smov %s1697_s25 }
 0x787   : > { %p19_p5 = scmp.ge.s32.totalorder %s22_s29, 4   ;;  %s2064_s25 = smov %s1701_s26 }
 0x788   : > { %s2065_s26 = smov %s1820_s14  ;;  %s2066_s27 = smov %s1709_s28 }
 0x789   : > { %s2067_s28 = smov %s2069_s9  ;;  %21 = sbr.rel (!%p19_p5) target bundleno = 6 (0x6), region = 103 }
 0x78e   :  { %1173 = vsyncpa [#allocation6], 1 }
 0x78f   :  { %1175 = vsyncpa [#allocation6 + $0x1], 1 }
 0x790   :  { %1176 = vsyncpa [#allocation9], 1 }
 0x791   :  { %1177 = vsyncpa [#allocation7], 1 }
 0x792   :  { %1179 = vsyncpa [#allocation7 + $0x1], 1 }

</bundles_post_ra>
